<compile_context>
chip_gen: v5e
topology: v5e:2x2
jax: 0.10.0
libtpu: 0.0.40
codegen_flags: <defaults>
</compile_context>

<pallas_src>
import functools

import jax
import jax.numpy as jnp
from jax.experimental import pallas as pl
from jax.experimental.pallas import tpu as pltpu


def _round_up(x, m):
    return ((x + m - 1) // m) * m


def mlp_kernel(x_ref, w1_ref, w2_ref, o_ref, *, num_classes):
    """Fused flatten->Linear->ReLU->Linear->ReLU->Softmax on one batch tile.

    x_ref:  (TB, I)   f32 flattened input tile (cast to bf16 in-register)
    w1_ref: (I, H)    bf16 = classify_1.weight.T          (VMEM-resident)
    w2_ref: (H, OP)   bf16 = classify_2.weight.T, zero-padded to OP=128 lanes
    o_ref:  (TB, NC)  f32 softmax probabilities (NC = num_classes, narrow store)
    """
    # Cast on the VPU (idle under the DMA); HBM read stays at 4 B/elem, once.
    x = x_ref[...].astype(jnp.bfloat16)

    # Linear 1 (no bias) + ReLU  -- bf16 MXU matmul, f32 accumulation.
    h = jnp.dot(x, w1_ref[...], preferred_element_type=jnp.float32)
    h = jnp.maximum(h, 0.0)

    # Linear 2 (no bias) + ReLU -- narrow activations back to bf16 for the MXU.
    z = jnp.dot(h.astype(jnp.bfloat16), w2_ref[...],
                preferred_element_type=jnp.float32)
    z = jnp.maximum(z, 0.0)

    # Mask padded class lanes so they contribute exp(-inf) ~ 0 to the softmax.
    col = jax.lax.broadcasted_iota(jnp.int32, z.shape, dimension=1)
    z = jnp.where(col < num_classes, z, -1e30)

    # Softmax over the class axis (PyTorch dim=1 == last axis here).
    m = jnp.max(z, axis=-1, keepdims=True)
    e = jnp.exp(z - m)
    denom = jnp.sum(e, axis=-1, keepdims=True)
    probs = e * pl.reciprocal(denom, approx=True)

    # Narrow store: only the real classes go to HBM (masked vst, far fewer
    # bytes than a padded 128-lane f32 write).
    o_ref[...] = probs[:, :num_classes].astype(o_ref.dtype)


def prepare_params(w1, w2):
    """One-time weight prep: transpose to (in, out), pad class axis to 128, bf16.

    w1: (h, i)  PyTorch nn.Linear weight layout
    w2: (o, h)
    """
    h_nodes, i_nodes = w1.shape
    o_nodes, h2 = w2.shape
    assert h2 == h_nodes
    op = _round_up(max(o_nodes, 128), 128)          # lane-dense class axis for compute
    w1t = jnp.asarray(w1).T.astype(jnp.bfloat16)    # (i, h)
    w2t = jnp.asarray(w2).T.astype(jnp.bfloat16)    # (h, o)
    w2t_pad = jnp.pad(w2t, ((0, 0), (0, op - o_nodes)))
    return w1t, w2t_pad, o_nodes


def _vmem_bytes(tb, i, h, op, nc):
    # Double-buffered input/output blocks + resident weights + f32 temporaries.
    return (2 * tb * i * 4          # x blocks (f32, double-buffered)
            + 2 * tb * nc * 4       # out blocks (f32, double-buffered)
            + (i * h + h * op) * 2  # bf16 weights (resident)
            + tb * i * 2            # bf16 copy of x
            + tb * h * 4            # hidden activation (f32)
            + 4 * tb * op * 4)      # z / e / probs / slack (f32)


def _choose_batch_tile(b, i, h, op, nc):
    if b <= 256:
        tb = _round_up(b, 8)                     # one block, sublane-aligned f32
    else:
        # Big tiles amortize the ~0.35us per-grid-step overhead; keep >= 2 grid
        # steps so v7x's two TensorCores can split the "parallel" batch axis.
        tb = min(2048, _round_up((b + 1) // 2, 256))
    # Stay well under the 32 MiB scoped-VMEM default (v7x: 64 MiB physical).
    while tb > 256 and _vmem_bytes(tb, i, h, op, nc) > 28 * 1024 * 1024:
        tb = max(256, tb // 2)
    return tb


def torch_model_forward(x_nchw, w1t, w2t_pad, *, o_nodes):
    """x_nchw: (B,C,H,W) f32; w1t: (I,H) bf16; w2t_pad: (H,OP) bf16 -> (B,o_nodes) f32."""
    B = x_nchw.shape[0]
    I, H = w1t.shape
    OP = w2t_pad.shape[1]

    # x.view(x.size(0), -1): a free reshape. No cast, no pad in the wrapper.
    x2d = x_nchw.reshape(B, -1)
    assert x2d.shape[1] == I

    TB = _choose_batch_tile(B, I, H, OP, o_nodes)
    grid = (pl.cdiv(B, TB),)   # partial last block handled by Pallas masking

    cost = pl.CostEstimate(
        flops=2 * B * I * H + 2 * B * H * OP,
        transcendentals=B * OP,
        bytes_accessed=B * I * 4 + B * o_nodes * 4 + (I * H + H * OP) * 2,
    )

    return pl.pallas_call(
        functools.partial(mlp_kernel, num_classes=o_nodes),
        out_shape=jax.ShapeDtypeStruct((B, o_nodes), jnp.float32),
        grid=grid,
        in_specs=[
            pl.BlockSpec((TB, I), lambda i: (i, 0)),   # batch-tiled f32 input
            pl.BlockSpec((I, H), lambda i: (0, 0)),    # weights stay VMEM-resident
            pl.BlockSpec((H, OP), lambda i: (0, 0)),
        ],
        out_specs=pl.BlockSpec((TB, o_nodes), lambda i: (i, 0)),  # narrow output
        compiler_params=pltpu.CompilerParams(
            dimension_semantics=("parallel",),          # megacore-splittable
            vmem_limit_bytes=32 * 1024 * 1024,          # safe on v7x's 64 MiB VMEM
        ),
        cost_estimate=cost,
    )(x2d, w1t, w2t_pad)


if __name__ == "__main__":
    # Small shapes consistent with the module: i_nodes = C*H*W = 1*16*16 = 256.
    B, C, Himg, Wimg = 8, 1, 16, 16
    i_nodes, h_nodes, o_nodes = C * Himg * Wimg, 128, 10

    key = jax.random.PRNGKey(0)
    kx, k1, k2 = jax.random.split(key, 3)
    x = jax.random.normal(kx, (B, C, Himg, Wimg), dtype=jnp.float32)
    # PyTorch nn.Linear weight layout: (out_features, in_features).
    w1 = jax.random.normal(k1, (h_nodes, i_nodes), dtype=jnp.float32) * 0.05
    w2 = jax.random.normal(k2, (o_nodes, h_nodes), dtype=jnp.float32) * 0.05

    # One-time parameter prep (transpose / pad / bf16) -- not per-call work.
    w1t, w2t_pad, ncls = prepare_params(w1, w2)

    fwd = jax.jit(functools.partial(torch_model_forward, o_nodes=ncls))
    y_pred = jax.block_until_ready(fwd(x, w1t, w2t_pad))
    assert y_pred.shape == (B, ncls)

    # Reference 1: same bf16 matmul path in plain JAX (tight tolerance; the only
    # difference is the approx reciprocal in the softmax denominator).
    xf = x.reshape(B, -1).astype(jnp.bfloat16)
    hr = jnp.maximum(jnp.dot(xf, w1t, preferred_element_type=jnp.float32), 0.0)
    zr = jnp.maximum(jnp.dot(hr.astype(jnp.bfloat16), w2t_pad[:, :ncls],
                             preferred_element_type=jnp.float32), 0.0)
    ref_bf16 = jax.nn.softmax(zr, axis=1)
    assert jnp.allclose(y_pred, ref_bf16, atol=5e-3, rtol=5e-3), (
        float(jnp.max(jnp.abs(y_pred - ref_bf16))))

    # Reference 2: full-precision PyTorch-equivalent forward (loose tolerance;
    # bf16 MXU inputs are the only difference).
    hr32 = jnp.maximum(x.reshape(B, -1) @ w1.T, 0.0)
    zr32 = jnp.maximum(hr32 @ w2.T, 0.0)
    ref_f32 = jax.nn.softmax(zr32, axis=1)
    assert jnp.allclose(y_pred, ref_f32, atol=3e-2, rtol=3e-2), (
        float(jnp.max(jnp.abs(y_pred - ref_f32))))

    # TODO(synk): CrossEntropyLoss (training branch, y is not None) not implemented;
    # only the inference forward path is reproduced in the kernel.

    print("KERNEL_OK")
</pallas_src>

<mosaic_0001>
module attributes {stable_mosaic.version = 11 : i64} {
  func.func @mlp_kernel(%arg0: i32, %arg1: memref<8x256xf32, #tpu.memory_space<vmem>>, %arg2: memref<256x128xbf16, #tpu.memory_space<vmem>>, %arg3: memref<128x128xbf16, #tpu.memory_space<vmem>>, %arg4: memref<8x10xf32, #tpu.memory_space<vmem>>) attributes {dimension_semantics = [#tpu.dimension_semantics<parallel>], iteration_bounds = array<i64: 1>, scalar_prefetch = 0 : i64, scratch_operands = 0 : i64, tpu.core_type = #tpu.core_type<tc>, window_params = [{transform_indices = @transform_0, window_bounds = array<i64: 8, 256>}, {pipeline_mode = #tpu.pipeline_mode<synchronous>, transform_indices = @transform_1, window_bounds = array<i64: 256, 128>}, {pipeline_mode = #tpu.pipeline_mode<synchronous>, transform_indices = @transform_2, window_bounds = array<i64: 128, 128>}, {transform_indices = @transform_3, window_bounds = array<i64: 8, 10>}]} {
    %c0 = arith.constant 0 : index
    %c0_0 = arith.constant 0 : index
    %0 = vector.load %arg1[%c0, %c0_0] : memref<8x256xf32, #tpu.memory_space<vmem>>, vector<8x256xf32>
    %1 = arith.truncf %0 : vector<8x256xf32> to vector<8x256xbf16>
    %c0_1 = arith.constant 0 : index
    %c0_2 = arith.constant 0 : index
    %2 = vector.load %arg2[%c0_1, %c0_2] : memref<256x128xbf16, #tpu.memory_space<vmem>>, vector<256x128xbf16>
    %cst = arith.constant dense<0.000000e+00> : vector<8x128xf32>
    %3 = tpu.matmul %1, %2, %cst {dimension_numbers = #tpu.dot_dimension_numbers<[1], [0], [0], [1], [0, 0, 1, 1], [], []>} : vector<8x256xbf16>, vector<256x128xbf16>, vector<8x128xf32> -> vector<8x128xf32>
    %cst_3 = arith.constant 0.000000e+00 : f32
    %4 = vector.broadcast %cst_3 : f32 to vector<8x128xf32>
    %5 = arith.maximumf %3, %4 : vector<8x128xf32>
    %6 = arith.truncf %5 : vector<8x128xf32> to vector<8x128xbf16>
    %c0_4 = arith.constant 0 : index
    %c0_5 = arith.constant 0 : index
    %7 = vector.load %arg3[%c0_4, %c0_5] : memref<128x128xbf16, #tpu.memory_space<vmem>>, vector<128x128xbf16>
    %cst_6 = arith.constant dense<0.000000e+00> : vector<8x128xf32>
    %8 = tpu.matmul %6, %7, %cst_6 {dimension_numbers = #tpu.dot_dimension_numbers<[1], [0], [0], [1], [0, 0, 1, 1], [], []>} : vector<8x128xbf16>, vector<128x128xbf16>, vector<8x128xf32> -> vector<8x128xf32>
    %cst_7 = arith.constant 0.000000e+00 : f32
    %9 = vector.broadcast %cst_7 : f32 to vector<8x128xf32>
    %10 = arith.maximumf %8, %9 : vector<8x128xf32>
    %11 = tpu.iota {dimensions = array<i32: 1>} : vector<8x128xi32>
    %c10_i32 = arith.constant 10 : i32
    %12 = vector.broadcast %c10_i32 : i32 to vector<8x128xi32>
    %13 = arith.cmpi slt, %11, %12 : vector<8x128xi32>
    %cst_8 = arith.constant -1.000000e+30 : f32
    %14 = vector.broadcast %cst_8 : f32 to vector<8x128xf32>
    %15 = arith.select %13, %10, %14 : vector<8x128xi1>, vector<8x128xf32>
    %cst_9 = arith.constant dense<0xFF800000> : vector<8xf32>
    %16 = vector.multi_reduction <maximumf>, %15, %cst_9 [1] : vector<8x128xf32> to vector<8xf32>
    %17 = vector.shape_cast %16 : vector<8xf32> to vector<8x1xf32>
    %18 = vector.broadcast %17 : vector<8x1xf32> to vector<8x128xf32>
    %19 = arith.subf %15, %18 : vector<8x128xf32>
    %20 = math.exp %19 : vector<8x128xf32>
    %cst_10 = arith.constant dense<0.000000e+00> : vector<8xf32>
    %21 = vector.multi_reduction <add>, %20, %cst_10 [1] : vector<8x128xf32> to vector<8xf32>
    %22 = vector.shape_cast %21 : vector<8xf32> to vector<8x1xf32>
    %23 = tpu.reciprocal %22 {approx = true} : vector<8x1xf32> -> vector<8x1xf32>
    %24 = vector.broadcast %23 : vector<8x1xf32> to vector<8x128xf32>
    %25 = arith.mulf %20, %24 : vector<8x128xf32>
    %26 = vector.extract_strided_slice %25 {offsets = [0, 0], sizes = [8, 10], strides = [1, 1]} : vector<8x128xf32> to vector<8x10xf32>
    %c0_11 = arith.constant 0 : index
    %c0_12 = arith.constant 0 : index
    %27 = vector.load %arg4[%c0_11, %c0_12] : memref<8x10xf32, #tpu.memory_space<vmem>>, vector<8x10xf32>
    tpu.vector_store %arg4[%c0_11, %c0_12], %26 {strides = array<i32>} : memref<8x10xf32, #tpu.memory_space<vmem>>, vector<8x10xf32>,
    return
  }
  func.func @transform_0(%arg0: i32) -> (i32, i32) {
    %c0_i32 = arith.constant 0 : i32
    %c0_i32_0 = arith.constant 0 : i32
    return %arg0, %c0_i32 : i32, i32
  }
  func.func @transform_1(%arg0: i32) -> (i32, i32) {
    %c0_i32 = arith.constant 0 : i32
    %c0_i32_0 = arith.constant 0 : i32
    %c0_i32_1 = arith.constant 0 : i32
    return %c0_i32, %c0_i32_0 : i32, i32
  }
  func.func @transform_2(%arg0: i32) -> (i32, i32) {
    %c0_i32 = arith.constant 0 : i32
    %c0_i32_0 = arith.constant 0 : i32
    %c0_i32_1 = arith.constant 0 : i32
    return %c0_i32, %c0_i32_0 : i32, i32
  }
  func.func @transform_3(%arg0: i32) -> (i32, i32) {
    %c0_i32 = arith.constant 0 : i32
    %c0_i32_0 = arith.constant 0 : i32
    return %arg0, %c0_i32 : i32, i32
  }
}

</mosaic_0001>

<bundles_post_ra>
// kernel: torch_model_forward.1
= control target key start
LH: loop header
LB: loop body
LE: loop exit
PB: predicated region body
PF: predicated region fallthrough
CT: control target
= control target key end

     0   :  { %8 = vsyncpa [#allocation3], 0  ;;  %s565_s0 = inlined_call_operand.vmem [shape: f32[8,256], index: 0, kind: input, shape index: {}]   ;;  %s566_s1 = inlined_call_operand.vmem [shape: bf16[256,128], index: 1, kind: input, shape index: {}]   ;;  %s567_s2 = inlined_call_operand.hbm [shape: bf16[128,128], index: 2, kind: input, shape index: {}]   ;;  %s568_s3 = inlined_call_operand.hbm [shape: f32[8,10], index: 3, kind: output, shape index: {}]  }
   0x1   :  { %9 = vsyncpa [#allocation4], 0  ;;  %s18_s14 = sshll.u32 %s567_s2, 4  ;;  %s481_s15 = smov [#allocation2]   ;;  %s19_s14 = int_to_ptr.hbm [resolvable:$true] %s18_s14 }
   0x2   :  { %s20_s16 = sshll.u32 %s481_s15, 4  ;;  %s482_s17 = smov 64   ;;  %s21_s16 = int_to_ptr.vmem [resolvable:$true] %s20_s16 }
   0x3   :  { %s483_s18 = smov 4  }
   0x4   :  { %26 = dma.hbm_to_vmem [thread:$0]  %s19_s14, 1024, %s21_s16, [#allocation3], %s482_s17, %s482_s17, %s483_s18  }
   0x5   :  { %477 = dma.done.wait [#allocation3], 1024  }
   0x6   :  { %478 = vsyncadd [#allocation3], 4294966272  ;;  %v404_v0 = vld [vmem:[%s566_s1 + $0x38] sm:$0xff]  ;;  %v403_v2 = vld [vmem:[%s566_s1 + $0x30] sm:$0xff]  ;;  %v269_v35 = vlaneseq  ;;  %s291_s28 = sshll.u32 %s568_s3, 4  ;;  %vm282_vm1 = vcmask 80896   ;;  %s292_s28 = int_to_ptr.hbm [resolvable:$true] %s291_s28 }
   0x7   :  { %v412_v1 = vld [vmem:[%s566_s1 + $0x78] sm:$0xff]  ;;  %163 = vmatpush.bf16.msra.mxu0 %v404_v0  ;;  %v411_v3 = vld [vmem:[%s566_s1 + $0x70] sm:$0xff]  ;;  %v402_v4 = vld [vmem:[%s566_s1 + $0x28] sm:$0xff] }
   0x8   :  { %176 = vmatpush.bf16.msra.mxu1 %v412_v1  ;;  %v410_v5 = vld [vmem:[%s566_s1 + $0x68] sm:$0xff]  ;;  %v420_v6 = vld [vmem:[#allocation2 + $0x38] sm:$0xff]  ;;  %v419_v7 = vld [vmem:[#allocation2 + $0x30] sm:$0xff]  ;;  %v270_v36 = vand.u32 127, %v269_v35 }
   0x9   :  { %255 = vmatpush.bf16.msra.mxu2 %v420_v6  ;;  %v401_v8 = vld [vmem:[%s566_s1 + $0x20] sm:$0xff]  ;;  %v418_v10 = vld [vmem:[#allocation2 + $0x28] sm:$0xff]  ;;  %v400_v11 = vld [vmem:[%s566_s1 + $0x18] sm:$0xff] }
   0xa   :  { %v409_v9 = vld [vmem:[%s566_s1 + $0x60] sm:$0xff]  ;;  %v408_v12 = vld [vmem:[%s566_s1 + $0x58] sm:$0xff]  ;;  %v399_v14 = vld [vmem:[%s566_s1 + $0x10] sm:$0xff]  ;;  %vm271_vm0 = vcmp.lt.s32.totalorder %v270_v36, 10 }
   0xb   :  { %164 = vmatpush.bf16.msra.mxu0 %v403_v2  ;;  %v417_v13 = vld [vmem:[#allocation2 + $0x20] sm:$0xff]  ;;  %v407_v15 = vld [vmem:[%s566_s1 + $0x50] sm:$0xff]  ;;  %v416_v16 = vld [vmem:[#allocation2 + $0x18] sm:$0xff] }
   0xc   :  { %177 = vmatpush.bf16.msra.mxu1 %v411_v3  ;;  %v398_v17 = vld [vmem:[%s566_s1 + $0x8] sm:$0xff]  ;;  %v415_v19 = vld [vmem:[#allocation2 + $0x10] sm:$0xff]  ;;  %v397_v20 = vld [vmem:[%s566_s1] sm:$0xff] }
   0xd   :  { %256 = vmatpush.bf16.msra.mxu2 %v419_v7  ;;  %v406_v18 = vld [vmem:[%s566_s1 + $0x48] sm:$0xff]  ;;  %v405_v21 = vld [vmem:[%s566_s1 + $0x40] sm:$0xff] }
   0xe   :  { %v31_v22 = vld [vmem:[%s565_s0] sm:$0xff]  ;;  %v32_v23 = vld [vmem:[%s565_s0 + $0x8] sm:$0xff]  ;;  %s484_s0 = smov [#allocation5]  }
   0xf   :  { %165 = vmatpush.bf16.msra.mxu0 %v402_v4  ;;  %v33_v24 = vpack.c.bf16 %v31_v22, %v31_v22  ;;  %v34_v25 = vpack.c.bf16 %v32_v23, %v32_v23  ;;  %v414_v26 = vld [vmem:[#allocation2 + $0x8] sm:$0xff]  ;;  %v413_v27 = vld [vmem:[#allocation2] sm:$0xff]  ;;  %s289_s1 = sshll.u32 %s484_s0, 4  ;;  %s290_s1 = int_to_ptr.vmem [resolvable:$true] %s289_s1 }
  0x10   :  { %178 = vmatpush.bf16.msra.mxu1 %v410_v5 }
  0x11   :  { %257 = vmatpush.bf16.msra.mxu2 %v418_v10 }
  0x13   :  { %166 = vmatpush.bf16.msra.mxu0 %v401_v8 }
  0x14   :  { %179 = vmatpush.bf16.msra.mxu1 %v409_v9 }
  0x15   :  { %258 = vmatpush.bf16.msra.mxu2 %v417_v13 }
  0x17   :  { %167 = vmatpush.bf16.msra.mxu0 %v400_v11 }
  0x18   :  { %180 = vmatpush.bf16.msra.mxu1 %v408_v12 }
  0x19   :  { %259 = vmatpush.bf16.msra.mxu2 %v416_v16 }
  0x1b   :  { %168 = vmatpush.bf16.msra.mxu0 %v399_v14 }
  0x1c   :  { %181 = vmatpush.bf16.msra.mxu1 %v407_v15 }
  0x1d   :  { %260 = vmatpush.bf16.msra.mxu2 %v415_v19 }
  0x1f   :  { %169 = vmatpush.bf16.msra.mxu0 %v398_v17 }
  0x20   :  { %182 = vmatpush.bf16.msra.mxu1 %v406_v18 }
  0x21   :  { %261 = vmatpush.bf16.msra.mxu2 %v414_v26 }
  0x23   :  { %170 = vmatpush.bf16.msra.mxu0 %v397_v20 }
  0x24   :  { %183 = vmatpush.bf16.msra.mxu1 %v405_v21 }
  0x25   :  { %262 = vmatpush.bf16.msra.mxu2 %v413_v27 }
  0x26   :  { %171 = vmatmul.bf16.vlgmr.msra.gmra.mxu0 %v33_v24 }
  0x27   :  { %184 = vmatmul.bf16.vlgmr.msra.gmra.mxu1 %v34_v25 }
  0xa3   :  { %v172_v28 = vpop.f32.mrf.mxu0 }
  0xa4   :  { %v185_v29 = vpop.f32.mrf.mxu1 }
  0xa5   :  { %v186_v30 = vadd.f32 %v185_v29, %v172_v28 }
  0xa7   :  { %v189_v31 = vmax.f32 %v186_v30, 0.0 }
  0xa9   :  { %v190_v32 = vpack.c.bf16 %v189_v31, %v189_v31 }
  0xab   :  { %263 = vmatmul.bf16.vlgmr.msra.gmra.mxu2 %v190_v32  ;;  %v174_v33 = vpop.f32.mrf.mxu0 }
  0xac   :  { %v187_v34 = vpop.f32.mrf.mxu1 }
 0x12e   :  { %v264_v37 = vpop.f32.mrf.mxu2 }
 0x12f   :  { %v268_v38 = vmax.f32 %v264_v37, 0.0 }
 0x131   :  { %v272_v39 = vsel %vm271_vm0, %v268_v38, -1e+30 }
 0x132   :  { %273 = vmax.xlane.f32.xlu0 %v272_v39 }
 0x136   :  { %v266_v40 = vpop.f32.mrf.mxu2 }
 0x1a5   :  { %v274_v41 = vpop.xlane.xlu0 %273 }
 0x1a6   :  { %v275_v42 = vsub.f32 %v272_v39, %v274_v41 }
 0x1a8   :  { %v276_v43 = vmul.f32 1.442695, %v275_v42 }
 0x1aa   :  { %425 = vpow2.f32 %v276_v43 }
 0x1b0   :  { %v426_v44 = vpop.eup %425 }
 0x1b1   :  { %278 = vadd.xlane.f32.xlu0 %v426_v44 }
 0x224   :  { %v279_v45 = vpop.xlane.xlu0 %278 }
 0x225   :  { %427 = vrcp.f32 %v279_v45 }
 0x22b   :  { %v428_v46 = vpop.eup %427 }
 0x22c   :  { %v281_v47 = vmul.f32 %v428_v46, %v426_v44 }
 0x22e   :  { %283 = vst.msk [vmem:[#allocation5] sm:$0xff] %vm282_vm1, %v281_v47 }
 0x22f   :  { %294 = dma.vmem_to_hbm [thread:$0]  %s290_s1, 128, %s292_s28, [#allocation4]  }
 0x230   :  { %479 = dma.done.wait [#allocation4], 128  }
 0x231   :  { %480 = vsyncadd [#allocation4], 4294967168 }
 0x232   :  { %299 = vsyncpa [#allocation3], 1 }
 0x233   :  { %300 = vsyncpa [#allocation4], 1 }

</bundles_post_ra>
